<compile_context>
chip_gen: v7x
topology: tpu7x:2x2x1
jax: 0.10.0
libtpu: 0.0.40
codegen_flags: <defaults>
</compile_context>

<pallas_src>
import functools

import jax
import jax.numpy as jnp
from jax.experimental import pallas as pl
from jax.experimental.pallas import tpu as pltpu


def _round_up(x, m):
    return (x + m - 1) // m * m


def _cdiv(a, b):
    return (a + b - 1) // b


def _vmem_capacity_bytes():
    try:
        info = pltpu.get_tpu_info()
        cap = getattr(info, "vmem_capacity_bytes", None)
        if cap:
            return int(cap)
    except Exception:
        pass
    return 64 * 1024 * 1024  # v7x is the smallest generation; safe default


# ---------------------------------------------------------------------------
# Parameter init / one-time prep
# ---------------------------------------------------------------------------
def init_mlp_params(key, input_dim, hidden_dim, output_dim, num_layers,
                    dtype=jnp.float32):
    """nn.Linear-style params: W_i is (out_i, in_i), b_i is (out_i,)."""
    h = [hidden_dim] * (num_layers - 1)
    dims_in = [input_dim] + h
    dims_out = h + [output_dim]
    params = []
    for n_in, n_out in zip(dims_in, dims_out):
        key, kw, kb = jax.random.split(key, 3)
        bound = 1.0 / jnp.sqrt(jnp.asarray(n_in, dtype))
        w = jax.random.uniform(kw, (n_out, n_in), dtype, -bound, bound)
        b = jax.random.uniform(kb, (n_out,), dtype, -bound, bound)
        params.append((w, b))
    return params


def prepare_params(params, *, compute_dtype=jnp.bfloat16, lane_pad=True):
    """One-time prep: (out,in)->(in,out), zero-pad hidden/output dims to 128
    lanes, cast weights to compute_dtype (bf16 for the MXU), keep biases f32.

    Returns (layers, out_dim) with layers = [(W_kn, b_1n), ...].
    Zero padding is exact: padded activation columns are relu(0 + 0) = 0 and
    padded weight rows multiply those zeros, so valid outputs are unchanged.
    """
    layers = []
    prev_out_pad = None
    out_dim = None
    for li, (w, b) in enumerate(params):
        n_out, n_in = w.shape
        out_dim = n_out
        w_kn = jnp.transpose(w)                 # (n_in, n_out)
        b_1n = b.reshape(1, -1)
        in_pad = n_in if li == 0 else prev_out_pad
        out_pad = _round_up(n_out, 128) if lane_pad else n_out
        if (in_pad != n_in) or (out_pad != n_out):
            w_kn = jnp.pad(w_kn, ((0, in_pad - n_in), (0, out_pad - n_out)))
            b_1n = jnp.pad(b_1n, ((0, 0), (0, out_pad - n_out)))
        layers.append((w_kn.astype(compute_dtype), b_1n.astype(jnp.float32)))
        prev_out_pad = out_pad
    return layers, out_dim


# ---------------------------------------------------------------------------
# Kernels
# ---------------------------------------------------------------------------
def _fused_mlp_kernel(*refs, num_layers, compute_dtype):
    """Fused MLP on one (TM, in_dim) row tile.

    refs = (x_ref, w1, b1, ..., wL, bL, o_ref)
      wi : (K_{i-1}, K_i)  full weight, VMEM-resident across grid steps
      bi : (1, K_i)        full bias (f32), VMEM-resident
    """
    x_ref = refs[0]
    o_ref = refs[-1]
    wb = refs[1:-1]
    exact = jnp.dtype(compute_dtype) == jnp.dtype(jnp.float32)
    prec = jax.lax.Precision.HIGHEST if exact else None

    y = x_ref[...].astype(jnp.float32)
    for i in range(num_layers):
        w = wb[2 * i][...]
        b = wb[2 * i + 1][...]
        # bf16 (or exact f32) matmul inputs, f32 accumulation + bias/ReLU.
        y = jnp.dot(y.astype(compute_dtype), w,
                    preferred_element_type=jnp.float32, precision=prec) + b
        if i < num_layers - 1:
            y = jnp.maximum(y, 0.0)
    o_ref[...] = y.astype(o_ref.dtype)


def _linear_kernel(x_ref, w_ref, b_ref, o_ref, *, apply_relu, compute_dtype):
    """Single linear(+ReLU) layer on one (TM, K) x (K, TN) tile pair."""
    exact = jnp.dtype(compute_dtype) == jnp.dtype(jnp.float32)
    prec = jax.lax.Precision.HIGHEST if exact else None
    y = jnp.dot(x_ref[...].astype(compute_dtype), w_ref[...],
                preferred_element_type=jnp.float32, precision=prec)
    y = y + b_ref[...]
    if apply_relu:
        y = jnp.maximum(y, 0.0)
    o_ref[...] = y.astype(o_ref.dtype)


def _linear_pallas(x2d, w_kn, b_1n, *, apply_relu, out_dtype, vmem_cap):
    """Fallback per-layer kernel: (M, N)-tiled, full K per step."""
    M, K = x2d.shape
    N = w_kn.shape[1]
    tm = min(_round_up(max(M, 1), 8), 512)
    tn = N if N <= 512 else 512
    w_is = jnp.dtype(w_kn.dtype).itemsize
    x_is = jnp.dtype(x2d.dtype).itemsize
    fp = (2 * tm * K * x_is + 2 * K * tn * w_is + 2 * tn * 4
          + 2 * tm * tn * jnp.dtype(out_dtype).itemsize + 3 * tm * tn * 4)
    vmem_limit = int(min(max(2 * fp, 8 * 1024 * 1024), 0.6 * vmem_cap))
    kernel = functools.partial(_linear_kernel, apply_relu=apply_relu,
                               compute_dtype=w_kn.dtype)
    return pl.pallas_call(
        kernel,
        out_shape=jax.ShapeDtypeStruct((M, N), out_dtype),
        grid=(_cdiv(M, tm), _cdiv(N, tn)),
        in_specs=[pl.BlockSpec((tm, K), lambda i, j: (i, 0)),
                  pl.BlockSpec((K, tn), lambda i, j: (0, j)),
                  pl.BlockSpec((1, tn), lambda i, j: (0, j))],
        out_specs=pl.BlockSpec((tm, tn), lambda i, j: (i, j)),
        compiler_params=pltpu.CompilerParams(
            dimension_semantics=("parallel", "parallel"),
            vmem_limit_bytes=vmem_limit),
    )(x2d, w_kn, b_1n)


# ---------------------------------------------------------------------------
# Forward
# ---------------------------------------------------------------------------
def mlp_forward(x, layers, out_dim, *, tm_target=512):
    """DETR MLP forward (ReLU on all but last layer)."""
    orig_shape = x.shape
    num_layers = len(layers)
    in_dim = layers[0][0].shape[0]
    out_pad = layers[-1][0].shape[1]
    assert orig_shape[-1] == in_dim

    x2d = x.reshape(-1, in_dim)
    M = x2d.shape[0]
    out_dtype = x.dtype

    # Row-tile size (multiple of 8).  Moderate M is split into >=2 grid steps
    # so the "parallel" axis feeds both TensorCores on v7x; large M uses
    # 512-row tiles (per-step overhead amortized, VMEM still comfortable).
    if M <= 8:
        tm = _round_up(max(M, 1), 8)
    elif M <= tm_target:
        tm = _round_up(_cdiv(M, 2), 8)
    else:
        tm = tm_target
    grid_m = _cdiv(M, tm)

    # VMEM footprint: single-buffered resident params + double-buffered x/out
    # tiles + f32 layer intermediates (and bf16 cast temps).
    x_is = jnp.dtype(out_dtype).itemsize
    param_bytes = 0
    max_feat = in_dim
    for w_kn, b_1n in layers:
        param_bytes += int(w_kn.size) * jnp.dtype(w_kn.dtype).itemsize
        param_bytes += int(b_1n.size) * jnp.dtype(b_1n.dtype).itemsize
        max_feat = max(max_feat, w_kn.shape[1])
    tile_bytes = 2 * tm * in_dim * x_is + 2 * tm * out_pad * x_is
    inter_bytes = 3 * tm * max_feat * 4
    footprint = param_bytes + tile_bytes + inter_bytes

    vmem_cap = _vmem_capacity_bytes()

    if footprint > 0.7 * vmem_cap:
        # Whole-MLP weights can't stay VMEM-resident (e.g. v7x 64 MiB):
        # per-layer tiled fallback instead of OOM'ing.
        # TODO(synk): K-tile the fallback (f32 accumulator scratch, "arbitrary"
        # K axis) for layers whose full-K slabs still don't fit VMEM.
        y = x2d
        for i, (w_kn, b_1n) in enumerate(layers):
            last = (i == num_layers - 1)
            y = _linear_pallas(y, w_kn, b_1n, apply_relu=not last,
                               out_dtype=(out_dtype if last else jnp.float32),
                               vmem_cap=vmem_cap)
        out2d = y
    else:
        vmem_limit = int(min(max(int(1.5 * footprint), 8 * 1024 * 1024),
                             0.6 * vmem_cap))
        compute_dtype = layers[0][0].dtype

        flat_wb = []
        in_specs = [pl.BlockSpec((tm, in_dim), lambda i: (i, 0))]
        for w_kn, b_1n in layers:
            flat_wb.append(w_kn)
            flat_wb.append(b_1n)
            # Constant index_map + Buffered(1): DMA'd once, single-buffered,
            # resident in VMEM across all grid steps.
            in_specs.append(pl.BlockSpec(w_kn.shape, lambda i: (0, 0),
                                         pipeline_mode=pl.Buffered(1)))
            in_specs.append(pl.BlockSpec(b_1n.shape, lambda i: (0, 0),
                                         pipeline_mode=pl.Buffered(1)))

        kernel = functools.partial(_fused_mlp_kernel, num_layers=num_layers,
                                   compute_dtype=compute_dtype)
        out2d = pl.pallas_call(
            kernel,
            out_shape=jax.ShapeDtypeStruct((M, out_pad), out_dtype),
            grid=(grid_m,),
            in_specs=in_specs,
            out_specs=pl.BlockSpec((tm, out_pad), lambda i: (i, 0)),
            compiler_params=pltpu.CompilerParams(
                dimension_semantics=("parallel",),
                vmem_limit_bytes=vmem_limit),
        )(x2d, *flat_wb)

    if out_pad != out_dim:
        out2d = out2d[:, :out_dim]
    return out2d.reshape(*orig_shape[:-1], out_dim)


if __name__ == "__main__":
    key = jax.random.PRNGKey(0)
    kx, kp = jax.random.split(key)

    # Small shapes consistent with the module's forward:
    # x: (batch=2, seq=8, input_dim=16); hidden=32, output=4, 3 layers.
    batch, seq, input_dim = 2, 8, 16
    hidden_dim, output_dim, num_layers = 32, 4, 3

    x = jax.random.normal(kx, (batch, seq, input_dim), dtype=jnp.float32)
    params = init_mlp_params(kp, input_dim, hidden_dim, output_dim, num_layers)

    # Plain-JAX f32 reference of the same math (PyTorch-layout params).
    ref = x.reshape(-1, input_dim)
    for i, (w, b) in enumerate(params):
        ref = jnp.dot(ref, w.T, precision=jax.lax.Precision.HIGHEST) + b
        if i < num_layers - 1:
            ref = jnp.maximum(ref, 0.0)
    ref = ref.reshape(batch, seq, output_dim)

    # Exact f32 path (verification at tight tolerance).
    layers_f32, out_dim = prepare_params(params, compute_dtype=jnp.float32)
    out_f32 = jax.block_until_ready(mlp_forward(x, layers_f32, out_dim))
    assert out_f32.shape == (batch, seq, output_dim)
    assert jnp.allclose(out_f32, ref, atol=1e-5, rtol=1e-5)

    # bf16 production path: bf16 matmul inputs, f32 accumulation/bias/ReLU.
    layers_bf16, out_dim = prepare_params(params, compute_dtype=jnp.bfloat16)
    out_bf16 = jax.block_until_ready(mlp_forward(x, layers_bf16, out_dim))
    assert out_bf16.shape == (batch, seq, output_dim)
    assert jnp.allclose(out_bf16, ref, atol=3e-2, rtol=3e-2)

    print("KERNEL_OK")
</pallas_src>

<mosaic_0001>
module attributes {stable_mosaic.version = 11 : i64} {
  func.func @_fused_mlp_kernel(%arg0: i32, %arg1: memref<8x16xf32, #tpu.memory_space<vmem>>, %arg2: memref<16x128xf32, #tpu.memory_space<vmem>>, %arg3: memref<1x128xf32, #tpu.memory_space<vmem>>, %arg4: memref<128x128xf32, #tpu.memory_space<vmem>>, %arg5: memref<1x128xf32, #tpu.memory_space<vmem>>, %arg6: memref<128x128xf32, #tpu.memory_space<vmem>>, %arg7: memref<1x128xf32, #tpu.memory_space<vmem>>, %arg8: memref<8x128xf32, #tpu.memory_space<vmem>>) attributes {dimension_semantics = [#tpu.dimension_semantics<parallel>], iteration_bounds = array<i64: 2>, scalar_prefetch = 0 : i64, scratch_operands = 0 : i64, tpu.core_type = #tpu.core_type<tc>, window_params = [{transform_indices = @transform_0, window_bounds = array<i64: 8, 16>}, {pipeline_mode = #tpu.pipeline_mode<synchronous>, transform_indices = @transform_1, window_bounds = array<i64: 16, 128>}, {pipeline_mode = #tpu.pipeline_mode<synchronous>, transform_indices = @transform_2, window_bounds = array<i64: 1, 128>}, {pipeline_mode = #tpu.pipeline_mode<synchronous>, transform_indices = @transform_3, window_bounds = array<i64: 128, 128>}, {pipeline_mode = #tpu.pipeline_mode<synchronous>, transform_indices = @transform_4, window_bounds = array<i64: 1, 128>}, {pipeline_mode = #tpu.pipeline_mode<synchronous>, transform_indices = @transform_5, window_bounds = array<i64: 128, 128>}, {pipeline_mode = #tpu.pipeline_mode<synchronous>, transform_indices = @transform_6, window_bounds = array<i64: 1, 128>}, {transform_indices = @transform_7, window_bounds = array<i64: 8, 128>}]} {
    %c0 = arith.constant 0 : index
    %c0_0 = arith.constant 0 : index
    %0 = vector.load %arg1[%c0, %c0_0] : memref<8x16xf32, #tpu.memory_space<vmem>>, vector<8x16xf32>
    %c0_1 = arith.constant 0 : index
    %c0_2 = arith.constant 0 : index
    %1 = vector.load %arg2[%c0_1, %c0_2] : memref<16x128xf32, #tpu.memory_space<vmem>>, vector<16x128xf32>
    %c0_3 = arith.constant 0 : index
    %c0_4 = arith.constant 0 : index
    %2 = vector.load %arg3[%c0_3, %c0_4] : memref<1x128xf32, #tpu.memory_space<vmem>>, vector<1x128xf32>
    %cst = arith.constant dense<0.000000e+00> : vector<8x128xf32>
    %3 = tpu.matmul %0, %1, %cst {dimension_numbers = #tpu.dot_dimension_numbers<[1], [0], [0], [1], [0, 0, 1, 1], [], []>, precision = #tpu.contract_precision<fp32>} : vector<8x16xf32>, vector<16x128xf32>, vector<8x128xf32> -> vector<8x128xf32>
    %4 = vector.broadcast %2 : vector<1x128xf32> to vector<8x128xf32>
    %5 = arith.addf %3, %4 : vector<8x128xf32>
    %cst_5 = arith.constant 0.000000e+00 : f32
    %6 = vector.broadcast %cst_5 : f32 to vector<8x128xf32>
    %7 = arith.maximumf %5, %6 : vector<8x128xf32>
    %c0_6 = arith.constant 0 : index
    %c0_7 = arith.constant 0 : index
    %8 = vector.load %arg4[%c0_6, %c0_7] : memref<128x128xf32, #tpu.memory_space<vmem>>, vector<128x128xf32>
    %c0_8 = arith.constant 0 : index
    %c0_9 = arith.constant 0 : index
    %9 = vector.load %arg5[%c0_8, %c0_9] : memref<1x128xf32, #tpu.memory_space<vmem>>, vector<1x128xf32>
    %cst_10 = arith.constant dense<0.000000e+00> : vector<8x128xf32>
    %10 = tpu.matmul %7, %8, %cst_10 {dimension_numbers = #tpu.dot_dimension_numbers<[1], [0], [0], [1], [0, 0, 1, 1], [], []>, precision = #tpu.contract_precision<fp32>} : vector<8x128xf32>, vector<128x128xf32>, vector<8x128xf32> -> vector<8x128xf32>
    %11 = vector.broadcast %9 : vector<1x128xf32> to vector<8x128xf32>
    %12 = arith.addf %10, %11 : vector<8x128xf32>
    %cst_11 = arith.constant 0.000000e+00 : f32
    %13 = vector.broadcast %cst_11 : f32 to vector<8x128xf32>
    %14 = arith.maximumf %12, %13 : vector<8x128xf32>
    %c0_12 = arith.constant 0 : index
    %c0_13 = arith.constant 0 : index
    %15 = vector.load %arg6[%c0_12, %c0_13] : memref<128x128xf32, #tpu.memory_space<vmem>>, vector<128x128xf32>
    %c0_14 = arith.constant 0 : index
    %c0_15 = arith.constant 0 : index
    %16 = vector.load %arg7[%c0_14, %c0_15] : memref<1x128xf32, #tpu.memory_space<vmem>>, vector<1x128xf32>
    %cst_16 = arith.constant dense<0.000000e+00> : vector<8x128xf32>
    %17 = tpu.matmul %14, %15, %cst_16 {dimension_numbers = #tpu.dot_dimension_numbers<[1], [0], [0], [1], [0, 0, 1, 1], [], []>, precision = #tpu.contract_precision<fp32>} : vector<8x128xf32>, vector<128x128xf32>, vector<8x128xf32> -> vector<8x128xf32>
    %18 = vector.broadcast %16 : vector<1x128xf32> to vector<8x128xf32>
    %19 = arith.addf %17, %18 : vector<8x128xf32>
    %c0_17 = arith.constant 0 : index
    %c0_18 = arith.constant 0 : index
    %20 = vector.load %arg8[%c0_17, %c0_18] : memref<8x128xf32, #tpu.memory_space<vmem>>, vector<8x128xf32>
    tpu.vector_store %arg8[%c0_17, %c0_18], %19 {strides = array<i32>} : memref<8x128xf32, #tpu.memory_space<vmem>>, vector<8x128xf32>,
    return
  }
  func.func @transform_0(%arg0: i32) -> (i32, i32) {
    %c0_i32 = arith.constant 0 : i32
    %c0_i32_0 = arith.constant 0 : i32
    return %arg0, %c0_i32 : i32, i32
  }
  func.func @transform_1(%arg0: i32) -> (i32, i32) {
    %c0_i32 = arith.constant 0 : i32
    %c0_i32_0 = arith.constant 0 : i32
    %c0_i32_1 = arith.constant 0 : i32
    return %c0_i32, %c0_i32_0 : i32, i32
  }
  func.func @transform_2(%arg0: i32) -> (i32, i32) {
    %c0_i32 = arith.constant 0 : i32
    %c0_i32_0 = arith.constant 0 : i32
    %c0_i32_1 = arith.constant 0 : i32
    return %c0_i32, %c0_i32_0 : i32, i32
  }
  func.func @transform_3(%arg0: i32) -> (i32, i32) {
    %c0_i32 = arith.constant 0 : i32
    %c0_i32_0 = arith.constant 0 : i32
    %c0_i32_1 = arith.constant 0 : i32
    return %c0_i32, %c0_i32_0 : i32, i32
  }
  func.func @transform_4(%arg0: i32) -> (i32, i32) {
    %c0_i32 = arith.constant 0 : i32
    %c0_i32_0 = arith.constant 0 : i32
    %c0_i32_1 = arith.constant 0 : i32
    return %c0_i32, %c0_i32_0 : i32, i32
  }
  func.func @transform_5(%arg0: i32) -> (i32, i32) {
    %c0_i32 = arith.constant 0 : i32
    %c0_i32_0 = arith.constant 0 : i32
    %c0_i32_1 = arith.constant 0 : i32
    return %c0_i32, %c0_i32_0 : i32, i32
  }
  func.func @transform_6(%arg0: i32) -> (i32, i32) {
    %c0_i32 = arith.constant 0 : i32
    %c0_i32_0 = arith.constant 0 : i32
    %c0_i32_1 = arith.constant 0 : i32
    return %c0_i32, %c0_i32_0 : i32, i32
  }
  func.func @transform_7(%arg0: i32) -> (i32, i32) {
    %c0_i32 = arith.constant 0 : i32
    %c0_i32_0 = arith.constant 0 : i32
    return %arg0, %c0_i32 : i32, i32
  }
}

</mosaic_0001>

<bundles_post_ra>
// kernel: tpu_custom_call.1
= control target key start
LH: loop header
LB: loop body
LE: loop exit
PB: predicated region body
PF: predicated region fallthrough
CT: control target
= control target key end

     0   :  { %12 = vsyncpa [#allocation3], 0  ;;  %s4453_s0 = inlined_call_operand.hbm [shape: f32[16,16], index: 0, kind: input, shape index: {}]   ;;  %s4454_s1 = inlined_call_operand.hbm [shape: f32[16,128], index: 1, kind: input, shape index: {}]   ;;  %s4455_s2 = inlined_call_operand.vmem [shape: f32[1,128], index: 2, kind: input, shape index: {}]   ;;  %s4456_s3 = inlined_call_operand.hbm [shape: f32[128,128], index: 3, kind: input, shape index: {}]   ;;  %s4457_s4 = inlined_call_operand.vmem [shape: f32[1,128], index: 4, kind: input, shape index: {}]   ;;  %s4458_s5 = inlined_call_operand.hbm [shape: f32[128,128], index: 5, kind: input, shape index: {}]   ;;  %s4459_s6 = inlined_call_operand.vmem [shape: f32[1,128], index: 6, kind: input, shape index: {}]   ;;  %s4460_s7 = inlined_call_operand.hbm [shape: f32[16,128], index: 7, kind: output, shape index: {}]  }
   0x1   :  { %14 = vsyncpa [#allocation3 + $0x1], 0 }
   0x2   :  { %15 = vsyncpa [#allocation6], 0 }
   0x3   :  { %16 = vsyncpa [#allocation9], 0 }
   0x4   :  { %17 = vsyncpa [#allocation4], 0 }
   0x5   :  { %19 = vsyncpa [#allocation4 + $0x1], 0  ;;  %s3620_s24 = smov 0   ;;  %s3622_s25 = smov 0  }
   0x6   :  { %s3624_s26 = smov 0   ;;  %s3626_s27 = smov 0  }
   0x7 LB: > { %s3641_s28 = sadd.s32 4294967295, %s3568_s27   ;;  %s2255_s29 = sadd.s32 4294967294, %s3568_s27   ;;  %s3568_s27 = sphi %s3626_s27, %s4518_s27   ;;  %s3564_s26 = sphi %s3624_s26, %s4517_s26   ;;  %s3560_s25 = sphi %s3622_s25, %s4516_s25   ;;  %s3556_s24 = sphi %s3620_s24, %s4515_s24  }
   0x8   : > { %p45_p0 = scmp.ne.s32.totalorder %s3560_s25, %s3556_s24  ;;  %p4461_p1 = scmp.eq.s32.totalorder %s3641_s28, 0 }
   0x9   : > { %p201_p3 = scmp.eq.s32.totalorder %s2255_s29, 1  ;;  %p2256_p5 = scmp.ge.s32.totalorder %s3568_s27, 1 }
   0xa   : > { %p3650_p4 = por %p4461_p1, %p45_p0  ;;  %p208_p7 = scmp.lt.s32.totalorder %s3568_s27, 3 }
   0xb   : > { %p3655_p6 = por %p201_p3, %p45_p0  ;;  %s3570_s10 = smov [#allocation5]  }
   0xc   : > { %s4481_s30 = scalar_select %p3650_p4, 1, 0 }
   0xd   : > { %s4482_s8 = scalar_select %p3655_p6, 1, 0 }
   0xe   : > { %p3660_p8 = pnand %p2256_p5, %p208_p7  ;;  %s220_s11 = sshll.u32 %s3570_s10, 4  ;;  %s3664_s11 = int_to_ptr.vmem [resolvable:$true] %s220_s11 }
   0xf   : > { %4483 = sst [smem:[#allocation15_spill]] %s4482_s8  ;;  %s3571_s13 = smov [#allocation7]  }
  0x10   : > { %s4484_s9 = scalar_select %p3660_p8, 1, 0 }
  0x11   : > { %p3314_p9 = pneg %p3660_p8  ;;  %s236_s14 = sshll.u32 %s3571_s13, 4  ;;  %s3675_s14 = int_to_ptr.vmem [resolvable:$true] %s236_s14 }
  0x12   : > { %s3572_s15 = smov [#allocation8]   ;;  %s3380_s19 = scalar_lea.hbm %s4454_s1, 256 }
  0x13   : > { %p3671_p11 = pnand %p3314_p9, %p4461_p1  ;;  %s3677_s16 = sshll.u32 %s3572_s15, 4  ;;  %s253_s16 = int_to_ptr.vmem [resolvable:$true] %s3677_s16 }
  0x14   : > { %p3381_p12 = scmp.ne.s32.totalorder %s4454_s1, %s3380_s19  ;;  %p3387_p5 = scmp.lt.u32.totalorder %s3380_s19, %s4454_s1 }
  0x15   : > { %p3687_p13 = pneg %p3671_p11 }
  0x17   : > { %p3383_p0 = pnand %p3687_p13, %p3381_p12 }
  0x19   : > { %p3384_p3 = pneg %p3383_p0 }
  0x1b   : > { %p3389_p7 = pnand %p3387_p5, %p3384_p3 }
  0x1d   : > { %3392 = shalt.err (!%p3389_p7)
}
  0x1e   : > { %s3393_s10 = scalar_lea.vmem %s3664_s11, 256  ;;  %p3401_p2 = scmp.lt.s32.totalorder %s3664_s11, %s3664_s11 }
  0x1f   : > { %p3394_p9 = scmp.ne.s32.totalorder %s3664_s11, %s3393_s10  ;;  %p3402_p6 = scmp.lt.s32.totalorder %s3393_s10, %s3393_s10 }
  0x21   : > { %p3396_p10 = pnand %p3394_p9, %p3687_p13  ;;  %p3403_p12 = por %p3402_p6, %p3401_p2 }
  0x23   : > { %p3397_p1 = pneg %p3396_p10 }
  0x25   : > { %p3404_p0 = pnand %p3403_p12, %p3397_p1 }
  0x27   : > { %3407 = shalt.err (!%p3404_p0)
}
  0x28   : > { %s3573_s13 = smov 128   ;;  %s3574_s15 = smov 8  }
  0x29   : > { %3317 = dma.hbm_to_vmem [thread:$0]  (!%p3671_p11), %s4454_s1, 256, %s3664_s11, [#allocation6], %s3573_s13, %s3573_s13, %s3574_s15  }
  0x2a   : > { %s3408_s21 = scalar_lea.hbm %s4456_s3, 2048 }
  0x2b   : > { %p3409_p1 = scmp.ne.s32.totalorder %s4456_s3, %s3408_s21  ;;  %p3415_p10 = scmp.lt.u32.totalorder %s3408_s21, %s4456_s3 }
  0x2d   : > { %p3411_p2 = pnand %p3409_p1, %p3687_p13 }
  0x2f   : > { %p3412_p6 = pneg %p3411_p2 }
  0x31   : > { %p3417_p3 = pnand %p3415_p10, %p3412_p6 }
  0x33   : > { %3420 = shalt.err (!%p3417_p3)
}
  0x34   : > { %s3421_s11 = scalar_lea.vmem %s3675_s14, 2048  ;;  %p3429_p12 = scmp.lt.s32.totalorder %s3675_s14, %s3675_s14 }
  0x35   : > { %p3422_p5 = scmp.ne.s32.totalorder %s3675_s14, %s3421_s11  ;;  %p3430_p0 = scmp.lt.s32.totalorder %s3421_s11, %s3421_s11 }
  0x37   : > { %p3424_p7 = pnand %p3422_p5, %p3687_p13  ;;  %p3431_p1 = por %p3430_p0, %p3429_p12 }
  0x39   : > { %p3425_p9 = pneg %p3424_p7 }
  0x3b   : > { %p3432_p2 = pnand %p3431_p1, %p3425_p9 }
  0x3d   : > { %3435 = shalt.err (!%p3432_p2)
}
  0x3e   : > { %3320 = dma.hbm_to_vmem [thread:$0]  (!%p3671_p11), %s4456_s3, 2048, %s3675_s14, [#allocation6], %s3573_s13, %s3573_s13, %s3574_s15  }
  0x3f   : > { %s3436_s20 = scalar_lea.hbm %s4458_s5, 2048 }
  0x40   : > { %p3437_p6 = scmp.ne.s32.totalorder %s4458_s5, %s3436_s20  ;;  %p3443_p5 = scmp.lt.u32.totalorder %s3436_s20, %s4458_s5 }
  0x42   : > { %p3439_p10 = pnand %p3437_p6, %p3687_p13 }
  0x44   : > { %p3440_p3 = pneg %p3439_p10 }
  0x46   : > { %p3445_p7 = pnand %p3443_p5, %p3440_p3 }
  0x48   : > { %3448 = shalt.err (!%p3445_p7)
}
  0x49   : > { %s3449_s11 = scalar_lea.vmem %s253_s16, 2048  ;;  %p3457_p1 = scmp.lt.s32.totalorder %s253_s16, %s253_s16 }
  0x4a   : > { %p3450_p9 = scmp.ne.s32.totalorder %s253_s16, %s3449_s11  ;;  %p3458_p2 = scmp.lt.s32.totalorder %s3449_s11, %s3449_s11 }
  0x4c   : > { %p3452_p12 = pnand %p3450_p9, %p3687_p13  ;;  %p3459_p4 = por %p3458_p2, %p3457_p1 }
  0x4e   : > { %p3453_p0 = pneg %p3452_p12 }
  0x50   : > { %p3460_p8 = pnand %p3459_p4, %p3453_p0 }
  0x52   : > { %3463 = shalt.err (!%p3460_p8)
}
  0x53   : > { %3323 = dma.hbm_to_vmem [thread:$0]  (!%p3671_p11), %s4458_s5, 2048, %s253_s16, [#allocation9], %s3573_s13, %s3573_s13, %s3574_s15  }
  0x54   : > { %s3760_s22 = sadd.s32 1, %s3568_s27   ;;  %s32_s17 = sadd.s32 1, %s3564_s26 }
  0x55   : > { %s29_s12 = ssub.s32 %s3568_s27, %s3760_s22  ;;  %p39_p8 = scmp.ne.s32.totalorder %s3564_s26, %s3560_s25 }
  0x56   : > { %p30_p4 = scmp.eq.s32.totalorder %s29_s12, 0  ;;  %p40_p13 = scmp.eq.s32.totalorder %s3568_s27, 0 }
  0x57   : > { %p3335_p6 = scmp.lt.s32.totalorder %s3568_s27, 2  ;;  %p4487_p3 = scmp.eq.s32.totalorder %s3641_s28, 1 }
  0x58   : > { %s3770_s18 = scalar_select %p30_p4, %s3564_s26, %s32_s17  }
  0x59   : > { %p41_p10 = por %p40_p13, %p39_p8  ;;  %p3774_p5 = por %p4487_p3, %p39_p8 }
  0x5a   : > { %s269_s20 = sand.u32 1, %s3564_s26   ;;  %s2262_s21 = sshll.u32 %s3568_s27, 7 }
  0x5b   : > { %s2261_s16 = sshll.u32 %s269_s20, 3  ;;  %s3783_s23 = scalar_lea.hbm %s4453_s0, %s2262_s21 }
  0x5c   : > { %s273_s29 = scalar_lea.vmem [#allocation2], %s2261_s16  ;;  %p3785_p11 = pnand %p3335_p6, %p41_p10 }
  0x5d   : > { %s280_s10 = sshll.u32 %s273_s29, 4  ;;  %s270_s14 = scalar_lea.sflag [#allocation3], %s269_s20  ;;  %s3789_s10 = int_to_ptr.vmem [resolvable:$true] %s280_s10 }
  0x5e   : > { %s3464_s8 = scalar_lea.hbm %s3783_s23, 128  ;;  %p3466_p9 = pneg %p3785_p11 }
  0x5f   : > { %p3465_p7 = scmp.ne.s32.totalorder %s3783_s23, %s3464_s8  ;;  %s3469_s21 = scalar_lea.hbm %s4453_s0, 256 }
  0x60   : > { %p3470_p1 = scmp.lt.u32.totalorder %s3783_s23, %s4453_s0  ;;  %p3471_p2 = scmp.lt.u32.totalorder %s3469_s21, %s3464_s8 }
  0x61   : > { %p3467_p12 = pnand %p3466_p9, %p3465_p7  ;;  %p3473_p8 = scmp.lt.u32.totalorder %s3464_s8, %s3783_s23 }
  0x62   : > { %p3472_p4 = por %p3471_p2, %p3470_p1 }
  0x63   : > { %p3468_p0 = pneg %p3467_p12 }
  0x64   : > { %p3474_p13 = por %p3473_p8, %p3472_p4 }
  0x66   : > { %p3475_p6 = pnand %p3474_p13, %p3468_p0 }
  0x68   : > { %3478 = shalt.err (!%p3475_p6)
}
  0x69   : > { %s3479_s20 = scalar_lea.vmem %s3789_s10, 128  ;;  %s3575_s15 = smov [#allocation2]  }
  0x6a   : > { %p3480_p10 = scmp.ne.s32.totalorder %s3789_s10, %s3479_s20  ;;  %s3484_s29 = sshll.u32 %s3575_s15, 4  ;;  %s3485_s29 = int_to_ptr.vmem [resolvable:$false] %s3484_s29 }
  0x6b   : > { %s3486_s12 = scalar_lea.vmem %s3485_s29, 256  ;;  %p3487_p12 = scmp.lt.s32.totalorder %s3789_s10, %s3485_s29 }
  0x6c   : > { %p3482_p3 = pnand %p3480_p10, %p3466_p9  ;;  %p3488_p1 = scmp.lt.s32.totalorder %s3486_s12, %s3479_s20 }
  0x6e   : > { %p3483_p7 = pneg %p3482_p3  ;;  %p3489_p2 = por %p3488_p1, %p3487_p12 }
  0x70   : > { %p3490_p4 = pnand %p3489_p2, %p3483_p7 }
  0x72   : > { %3493 = shalt.err (!%p3490_p4)
}
  0x73   : > { %3327 = dma.hbm_to_vmem [thread:$0]  (!%p3785_p11), %s3783_s23, 128, %s3789_s10, %s270_s14  }
  0x74   : > { %p4490_p0 = scmp.ne.s32.totalorder %s4484_s9, 0 }
  0x75   : > { %s3819_s8 = sand.u32 (!%p4490_p0), 1, %s3560_s25   ;;  %p4491_p9 = scmp.ne.s32.totalorder (!%p4490_p0), %s4481_s30, 0 }
  0x76   : > { %289 = sbr.rel (%p4490_p0) target bundleno = 1164 (0x48c), region = 48  ;;  %s2264_s17 = sshll.u32 (!%p4490_p0), %s3819_s8, 3 }
  0x77   : > { %s292_s21 = scalar_lea.sflag (!%p4490_p0), [#allocation3], %s3819_s8  ;;  %s295_s16 = scalar_lea.vmem (!%p4490_p0), [#allocation2], %s2264_s17 }
  0x7d   : > { %3539 = dma.done.wait (%p4491_p9), %s292_s21, 128  }
  0x7e   : > { %3541 = vsyncadd (%p4491_p9), %s292_s21, 4294967168  ;;  %p4492_p11 = scmp.eq.s32.totalorder %s3641_s28, 0 }
  0x80   : > { %3543 = dma.done.wait (%p4492_p11), [#allocation6], 2304   ;;  %p4493_p8 = pmov %p4492_p11 }
  0x82   : > { %3545 = vsyncadd (%p4493_p8), [#allocation6], 4294964992  ;;  %p4494_p13 = pmov %p4493_p8 }
  0x83   : > { %p4495_p6 = pmov %p4493_p8 }
  0x84   : > { %3547 = dma.done.wait (%p4494_p13), [#allocation9], 2048  }
  0x85   : > { %3549 = vsyncadd (%p4495_p6), [#allocation9], 4294965248  ;;  %v3576_v0 = vmov 0.0|0.0   ;;  %vm3577_vm0 = vmmov 0   ;;  %v3578_v1 = vmov 0.0   ;;  %vm348_vm1 = vcmask 130048  }
  0x86   : > { %2969 = vmatprep.subr.bf16.mxu0 %v3576_v0  ;;  %2523 = vmatprep.mubr.msk.f32.mxu0 %vm3577_vm0, %v3578_v1  ;;  %v339_v2 = vld [vmem:[#allocation5] sm:$0xff]  ;;  %v340_v3 = vld [vmem:[#allocation5 + $0x8] sm:$0xff]  ;;  %v338_v4 = vld [vmem:[%s295_s16] sm:$0xff]  ;;  %s2273_s13 = sshll.u32 %s3641_s28, 7  ;;  %s337_s20 = scalar_lea.vmem [#allocation10], %s2264_s17 }
  0x87   : > { %2960 = vmatprep.subr.bf16.mxu1 %v3576_v0  ;;  %2502 = vmatprep.mubr.msk.f32.mxu1 %vm3577_vm0, %v3578_v1  ;;  %v353_v5 = vand.u32 4294901760, %v339_v2  ;;  %v356_v6 = vand.u32 4294901760, %v340_v3  ;;  %v350_v7 = vsel %vm348_vm1, %v338_v4, 0  ;;  %v812_v8 = vld [vmem:[#allocation7] sm:$0xff]  ;;  %v813_v9 = vld [vmem:[#allocation7 + $0x8] sm:$0xff]  ;;  %v814_v10 = vld [vmem:[#allocation7 + $0x10] sm:$0xff]  ;;  %s4409_s21 = scalar_lea.hbm %s4460_s7, %s2273_s13 }
  0x88   : > { %v419_v11 = vand.u32 4294901760, %v350_v7  ;;  %v836_v12 = vand.u32 4294901760, %v812_v8  ;;  %v839_v13 = vand.u32 4294901760, %v813_v9  ;;  %v815_v14 = vld [vmem:[#allocation7 + $0x18] sm:$0xff]  ;;  %v842_v18 = vand.u32 4294901760, %v814_v10  ;;  %v816_v19 = vld [vmem:[#allocation7 + $0x20] sm:$0xff] }
  0x89   : > { %v2961_v15 = vpack.c.bf16 %v356_v6, %v353_v5  ;;  %v431_v16 = vsub.f32 %v339_v2, %v353_v5  ;;  %v438_v17 = vsub.f32 %v340_v3, %v356_v6  ;;  %v845_v23 = vand.u32 4294901760, %v815_v14  ;;  %v817_v24 = vld [vmem:[#allocation7 + $0x28] sm:$0xff]  ;;  %v818_v46 = vld [vmem:[#allocation7 + $0x30] sm:$0xff]  ;;  %v819_v47 = vld [vmem:[#allocation7 + $0x38] sm:$0xff]  ;;  %s2156_s15 = sshll.u32 %s337_s20, 4  ;;  %s2143_s16 = scalar_lea.sflag [#allocation4], %s3819_s8  ;;  %s4411_s15 = int_to_ptr.vmem [resolvable:$true] %s2156_s15 }
  0x8a   : > { %v420_v20 = vsub.f32 %v350_v7, %v419_v11  ;;  %v3843_v21 = vsub.f32 %v812_v8, %v836_v12  ;;  %v3845_v22 = vsub.f32 %v813_v9, %v839_v13  ;;  %v3849_v28 = vsub.f32 %v814_v10, %v842_v18  ;;  %v820_v51 = vld [vmem:[#allocation7 + $0x40] sm:$0xff]  ;;  %v821_v52 = vld [vmem:[#allocation7 + $0x48] sm:$0xff]  ;;  %v822_v58 = vld [vmem:[#allocation7 + $0x50] sm:$0xff]  ;;  %s3494_s30 = scalar_lea.vmem %s4411_s15, 128  ;;  %s3579_s28 = smov [#allocation10]  }
  0x8b   : > { %2971 = vmatpush3.bf16.msra.mxu0 %v2961_v15  ;;  %2962 = vmatpush3.bf16.msra.mxu1 %v2961_v15  ;;  %v432_v25 = vand.u32 4294901760, %v431_v16  ;;  %v439_v26 = vand.u32 4294901760, %v438_v17  ;;  %v3851_v29 = vsub.f32 %v815_v14, %v845_v23  ;;  %v848_v30 = vand.u32 4294901760, %v816_v19  ;;  %v823_v59 = vld [vmem:[#allocation7 + $0x58] sm:$0xff]  ;;  %v824_v63 = vld [vmem:[#allocation7 + $0x60] sm:$0xff]  ;;  %v825_v2 = vld [vmem:[#allocation7 + $0x68] sm:$0xff]  ;;  %p3495_p10 = scmp.ne.s32.totalorder %s4411_s15, %s3494_s30 }
  0x8c   : > { %v421_v27 = vand.u32 4294901760, %v420_v20  ;;  %2963 = vmatprep.subr.bf16.mxu1 %v3576_v0  ;;  %2972 = vmatprep.subr.bf16.mxu0 %v3576_v0  ;;  %v851_v34 = vand.u32 4294901760, %v817_v24  ;;  %v2967_v42 = vpack.c.bf16 %v438_v17, %v431_v16  ;;  %v3869_v43 = vpack.c.bf16 %v839_v13, %v836_v12  ;;  %v826_v6 = vld [vmem:[#allocation7 + $0x70] sm:$0xff]  ;;  %v827_v7 = vld [vmem:[#allocation7 + $0x78] sm:$0xff]  ;;  %s3498_s17 = sshll.u32 %s3579_s28, 4  ;;  %s3499_s17 = int_to_ptr.vmem [resolvable:$false] %s3498_s17 }
  0x8d   : > { %v433_v31 = vsub.f32 %v431_v16, %v432_v25  ;;  %v440_v32 = vsub.f32 %v438_v17, %v439_v26  ;;  %v2973_v33 = vpack.c.bf16 %v439_v26, %v432_v25  ;;  %v3853_v36 = vsub.f32 %v816_v19, %v848_v30  ;;  %p3496_p3 = pnand %p3495_p10, %p3774_p5  ;;  %s3500_s9 = scalar_lea.vmem %s3499_s17, 256 }
  0x8e   : > { %2524 = vmatmul.mubr.f32.vlgmr.msra.gmra.mrb[0].mxu0 %v421_v27  ;;  %v422_v35 = vsub.f32 %v420_v20, %v421_v27  ;;  %v3857_v39 = vsub.f32 %v817_v24, %v851_v34  ;;  %v3874_v44 = vpack.c.bf16 %v845_v23, %v842_v18  ;;  %v3880_v45 = vpack.c.bf16 %v851_v34, %v848_v30  ;;  %p3501_p12 = scmp.lt.s32.totalorder %s4411_s15, %s3499_s17  ;;  %p3502_p1 = scmp.lt.s32.totalorder %s3500_s9, %s3494_s30 }
  0x8f   : > { %v434_v37 = vand.u32 4294901760, %v433_v31  ;;  %v441_v38 = vand.u32 4294901760, %v440_v32  ;;  %2974 = vmatpush3.bf16.msra.mxu0 %v2973_v33  ;;  %2530 = vmatprep.mubr.msk.f32.mxu0 %vm3577_vm0, %v3578_v1  ;;  %v854_v48 = vand.u32 4294901760, %v818_v46  ;;  %v857_v49 = vand.u32 4294901760, %v819_v47  ;;  %p3497_p7 = pneg %p3496_p3 }
  0x90   : > { %v423_v40 = vand.u32 4294901760, %v422_v35  ;;  %2975 = vmatprep.subr.bf16.mxu0 %v3576_v0  ;;  %v860_v55 = vand.u32 4294901760, %v820_v51  ;;  %v863_v56 = vand.u32 4294901760, %v821_v52  ;;  %v866_v60 = vand.u32 4294901760, %v822_v58  ;;  %p3503_p2 = por %p3502_p1, %p3501_p12 }
  0x91   : > { %v2964_v41 = vpack.c.bf16 %v441_v38, %v434_v37  ;;  %v3885_v50 = vpack.c.bf16 %v857_v49, %v854_v48  ;;  %v3888_v53 = vsub.f32 %v818_v46, %v854_v48  ;;  %v3890_v54 = vsub.f32 %v819_v47, %v857_v49 }
  0x92   : > { %2503 = vmatmul.mubr.f32.vlgmr.msra.gmra.mrb[0].mxu1 %v423_v40  ;;  %v3893_v57 = vpack.c.bf16 %v863_v56, %v860_v55  ;;  %v869_v61 = vand.u32 4294901760, %v823_v59  ;;  %v872_v3 = vand.u32 4294901760, %v824_v63  ;;  %v875_v4 = vand.u32 4294901760, %v825_v2  ;;  %p3504_p4 = pnand %p3503_p2, %p3497_p7 }
  0x93   : > { %2965 = vmatpush3.bf16.msra.mxu1 %v2964_v41  ;;  %2509 = vmatprep.mubr.msk.f32.mxu1 %vm3577_vm0, %v3578_v1  ;;  %v878_v8 = vand.u32 4294901760, %v826_v6  ;;  %v881_v9 = vand.u32 4294901760, %v827_v7  ;;  %v929_v10 = vand.u32 4294901760, %v3843_v21  ;;  %v3907_v12 = vsub.f32 %v820_v51, %v860_v55 }
  0x94   : > { %2966 = vmatprep.subr.bf16.mxu1 %v3576_v0  ;;  %v3897_v62 = vpack.c.bf16 %v869_v61, %v866_v60  ;;  %v3901_v5 = vpack.c.bf16 %v875_v4, %v872_v3  ;;  %v3909_v13 = vsub.f32 %v821_v52, %v863_v56  ;;  %v3911_v14 = vsub.f32 %v822_v58, %v866_v60 }
  0x95   : > { %v3915_v16 = vsub.f32 %v824_v63, %v872_v3  ;;  %v3917_v17 = vsub.f32 %v825_v2, %v875_v4  ;;  %v3919_v18 = vpack.c.bf16 %v881_v9, %v878_v8  ;;  %v3921_v19 = vsub.f32 %v826_v6, %v878_v8 }
  0x96   : > { %2531 = vmatmul.mubr.f32.vlgmr.msra.gmra.mrb[0].mxu0 %v419_v11  ;;  %v930_v23 = vsub.f32 %v3843_v21, %v929_v10  ;;  %v943_v25 = vand.u32 4294901760, %v3849_v28  ;;  %v950_v26 = vand.u32 4294901760, %v3851_v29  ;;  %v4476_v37 = vand.u32 4294901760, %v3853_v36 }
  0x97   : > { %2977 = vmatpush3.bf16.msra.mxu0 %v2961_v15  ;;  %2537 = vmatprep.mubr.msk.f32.mxu0 %vm3577_vm0, %v3578_v1  ;;  %v3913_v15 = vsub.f32 %v823_v59, %v869_v61  ;;  %v4475_v38 = vand.u32 4294901760, %v3857_v39  ;;  %v4474_v48 = vand.u32 4294901760, %v3888_v53  ;;  %v4473_v49 = vand.u32 4294901760, %v3890_v54 }
  0x98   : > { %3122 = vmatprep.subr.bf16.mxu0 %v3576_v0  ;;  %v931_v27 = vand.u32 4294901760, %v930_v23  ;;  %v944_v31 = vsub.f32 %v3849_v28, %v943_v25  ;;  %v951_v32 = vsub.f32 %v3851_v29, %v950_v26  ;;  %v958_v41 = vsub.f32 %v3853_v36, %v4476_v37 }
  0x99   : > { %v972_v52 = vsub.f32 %v3888_v53, %v4474_v48  ;;  %v979_v55 = vsub.f32 %v3890_v54, %v4473_v49  ;;  %v4472_v59 = vand.u32 4294901760, %v3907_v12  ;;  %v4471_v60 = vand.u32 4294901760, %v3909_v13 }
  0x9a   : > { %2510 = vmatmul.mubr.f32.vlgmr.msra.gmra.mrb[0].mxu1 %v419_v11  ;;  %v945_v34 = vand.u32 4294901760, %v944_v31  ;;  %v952_v35 = vand.u32 4294901760, %v951_v32  ;;  %v959_v46 = vand.u32 4294901760, %v958_v41  ;;  %v4470_v6 = vand.u32 4294901760, %v3911_v14 }
  0x9b   : > { %2968 = vmatpush3.bf16.msra.mxu1 %v2967_v42  ;;  %2516 = vmatprep.mubr.msk.f32.mxu1 %vm3577_vm0, %v3578_v1  ;;  %v965_v42 = vsub.f32 %v3857_v39, %v4475_v38  ;;  %v973_v56 = vand.u32 4294901760, %v972_v52  ;;  %v980_v58 = vand.u32 4294901760, %v979_v55  ;;  %v986_v63 = vsub.f32 %v3907_v12, %v4472_v59  ;;  %v1486_v59 = vld [vmem:[#allocation8 + $0x48] sm:$0xff] }
  0x9c   : > { %2978 = vmatprep.subr.bf16.mxu1 %v3576_v0  ;;  %v3945_v40 = vpack.c.bf16 %v952_v35, %v945_v34  ;;  %v993_v2 = vsub.f32 %v3909_v13, %v4471_v60  ;;  %v4467_v31 = vand.u32 4294901760, %v3917_v17 }
  0x9d   : > { %v966_v47 = vand.u32 4294901760, %v965_v42  ;;  %v3012_v61 = vpack.c.bf16 %v980_v58, %v973_v56  ;;  %v987_v3 = vand.u32 4294901760, %v986_v63 }
  0x9e   : > { %2538 = vmatmul.mubr.f32.vlgmr.msra.gmra.mrb[0].mxu0 %v419_v11  ;;  %v936_v11 = vand.u32 4294901760, %v3845_v22  ;;  %v994_v4 = vand.u32 4294901760, %v993_v2  ;;  %v1021_v35 = vsub.f32 %v3917_v17, %v4467_v31 }
  0x9f   : > { %2782 = vmatprep.mubr.msk.f32.mxu0 %vm3577_vm0, %v3578_v1  ;;  %v3009_v51 = vpack.c.bf16 %v966_v47, %v959_v46  ;;  %v4466_v46 = vand.u32 4294901760, %v3921_v19 }
  0xa0   : > { %v937_v24 = vsub.f32 %v3845_v22, %v936_v11  ;;  %v3015_v8 = vpack.c.bf16 %v994_v4, %v987_v3  ;;  %v1022_v42 = vand.u32 4294901760, %v1021_v35  ;;  %v3027_v3 = vpack.c.bf16 %v3845_v22, %v3843_v21 }
  0xa1   : > { %v1028_v55 = vsub.f32 %v3921_v19, %v4466_v46  ;;  %v3030_v4 = vpack.c.bf16 %v3851_v29, %v3849_v28  ;;  %v4496_v21 = vand.u32 4294901760, %v3853_v36  ;;  %v4497_v22 = vand.u32 4294901760, %v3857_v39 }
  0xa2   : > { %2517 = vmatmul.mubr.f32.vlgmr.msra.gmra.mrb[0].mxu1 %v420_v20  ;;  %v3923_v20 = vsub.f32 %v827_v7, %v881_v9  ;;  %v938_v30 = vand.u32 4294901760, %v937_v24  ;;  %v4469_v7 = vand.u32 4294901760, %v3913_v15  ;;  %v1000_v9 = vsub.f32 %v3911_v14, %v4470_v6 }
  0xa3   : > { %2980 = vmatpush3.bf16.msra.mxu1 %v3869_v43  ;;  %2572 = vmatprep.mubr.msk.f32.mxu1 %vm3577_vm0, %v3578_v1  ;;  %v1029_v58 = vand.u32 4294901760, %v1028_v55  ;;  %v2269_v55 = vld [vmem:[%s4455_s2] ss:$0 sm:$0xff]  ;;  %v4499_v28 = vand.u32 4294901760, %v3890_v54 }
  0xa4   : > { %2981 = vmatprep.subr.bf16.mxu1 %v3576_v0  ;;  %v3941_v33 = vpack.c.bf16 %v938_v30, %v931_v27  ;;  %v1007_v23 = vsub.f32 %v3913_v15, %v4469_v7  ;;  %v1001_v24 = vand.u32 4294901760, %v1000_v9  ;;  %v4468_v30 = vand.u32 4294901760, %v3915_v16 }
  0xa5   : > { %v4465_v47 = vand.u32 4294901760, %v3923_v20  ;;  %v3033_v9 = vpack.c.bf16 %v3857_v39, %v3853_v36  ;;  %v3048_v35 = vpack.c.bf16 %v3923_v20, %v3921_v19  ;;  %v4502_v36 = vand.u32 4294901760, %v3911_v14 }
  0xa6   : > { %v1008_v27 = vand.u32 4294901760, %v1007_v23  ;;  %v1014_v34 = vsub.f32 %v3915_v16, %v4468_v30  ;;  %v3036_v23 = vpack.c.bf16 %v3890_v54, %v3888_v53  ;;  %v4503_v39 = vand.u32 4294901760, %v3913_v15 }
  0xa7   : > { %2983 = vmatpush3.bf16.msra.mxu1 %v3874_v44  ;;  %v1035_v56 = vsub.f32 %v3923_v20, %v4465_v47  ;;  %v4505_v54 = vand.u32 4294901760, %v3917_v17 }
  0xa8   : > { %2984 = vmatprep.subr.bf16.mxu1 %v3576_v0  ;;  %v3018_v32 = vpack.c.bf16 %v1008_v27, %v1001_v24  ;;  %v1015_v41 = vand.u32 4294901760, %v1014_v34  ;;  %v3039_v24 = vpack.c.bf16 %v3909_v13, %v3907_v12  ;;  %v3042_v27 = vpack.c.bf16 %v3913_v15, %v3911_v14  ;;  %v1490_v15 = vld [vmem:[#allocation8 + $0x68] sm:$0xff] }
  0xa9   : > { %v1036_v63 = vand.u32 4294901760, %v1035_v56  ;;  %v3045_v34 = vpack.c.bf16 %v3917_v17, %v3915_v16  ;;  %v1491_v17 = vld [vmem:[#allocation8 + $0x70] sm:$0xff] }
  0xaa   : > { %v3021_v52 = vpack.c.bf16 %v1022_v42, %v1015_v41 }
  0xab   : > { %2986 = vmatpush3.bf16.msra.mxu1 %v3880_v45  ;;  %v3024_v2 = vpack.c.bf16 %v1036_v63, %v1029_v58 }
  0xac   : > { %2987 = vmatprep.subr.bf16.mxu1 %v3576_v0 }
  0xaf   : > { %2989 = vmatpush3.bf16.msra.mxu1 %v3885_v50 }
  0xb0   : > { %2990 = vmatprep.subr.bf16.mxu1 %v3576_v0 }
  0xb3   : > { %2992 = vmatpush3.bf16.msra.mxu1 %v3893_v57 }
  0xb4   : > { %2993 = vmatprep.subr.bf16.mxu1 %v3576_v0 }
  0xb7   : > { %2995 = vmatpush3.bf16.msra.mxu1 %v3897_v62 }
  0xb8   : > { %2996 = vmatprep.subr.bf16.mxu1 %v3576_v0 }
  0xbb   : > { %2998 = vmatpush3.bf16.msra.mxu1 %v3901_v5 }
  0xbc   : > { %2999 = vmatprep.subr.bf16.mxu1 %v3576_v0 }
  0xbf   : > { %3001 = vmatpush3.bf16.msra.mxu1 %v3919_v18 }
  0xc0   : > { %3002 = vmatprep.subr.bf16.mxu1 %v3576_v0 }
 0x171   : > { %v807_v41 = vpop.f32.mrb[0].mxu0 }
 0x172   : > { %v2539_v42 = vpop.f32.mrb[1].mxu0 }
 0x175   : > { %v582_v56 = vpop.f32.mrb[0].mxu1 }
 0x176   : > { %v3266_v58 = vadd.f32 %v2269_v55, %v582_v56  ;;  %v2518_v63 = vpop.f32.mrb[1].mxu1  ;;  %v1483_v55 = vld [vmem:[#allocation8 + $0x30] sm:$0xff]  ;;  %v1484_v56 = vld [vmem:[#allocation8 + $0x38] sm:$0xff] }
 0x178   : > { %v3267_v47 = vadd.f32 %v3266_v58, %v807_v41  ;;  %v1485_v58 = vld [vmem:[#allocation8 + $0x40] sm:$0xff] }
 0x17a   : > { %v811_v46 = vmax.f32 %v3267_v47, 0.0  ;;  %v1482_v47 = vld [vmem:[#allocation8 + $0x28] sm:$0xff] }
 0x17b   : > { %v1516_v41 = vand.u32 4294901760, %v1482_v47 }
 0x17c   : > { %v4012_v31 = vand.u32 4294901760, %v811_v46 }
 0x17d   : > { %v4055_v37 = vsub.f32 %v1482_v47, %v1516_v41 }
 0x17e   : > { %v4015_v30 = vsub.f32 %v811_v46, %v4012_v31  ;;  %v1481_v46 = vld [vmem:[#allocation8 + $0x20] sm:$0xff] }
 0x180   : > { %v918_v7 = vand.u32 4294901760, %v4015_v30 }
 0x182   : > { %v919_v42 = vsub.f32 %v4015_v30, %v918_v7 }
 0x184   : > { %v920_v6 = vand.u32 4294901760, %v919_v42 }
 0x186   : > { %2573 = vmatmul.mubr.f32.vlgmr.msra.gmra.mrb[2].mxu1 %v920_v6 }
 0x187   : > { %3004 = vmatpush3.bf16.msra.mxu1 %v3941_v33  ;;  %2607 = vmatprep.mubr.msk.f32.mxu1 %vm3577_vm0, %v3578_v1  ;;  %v1477_v33 = vld [vmem:[#allocation8] sm:$0xff] }
 0x188   : > { %3005 = vmatprep.subr.bf16.mxu1 %v3576_v0 }
 0x18b   : > { %3007 = vmatpush3.bf16.msra.mxu1 %v3945_v40  ;;  %v1478_v40 = vld [vmem:[#allocation8 + $0x8] sm:$0xff] }
 0x18c   : > { %3008 = vmatprep.subr.bf16.mxu1 %v3576_v0  ;;  %v1504_v6 = vand.u32 4294901760, %v1478_v40 }
 0x18e   : > { %v4041_v42 = vsub.f32 %v1478_v40, %v1504_v6  ;;  %v1522_v40 = vand.u32 4294901760, %v1484_v56 }
 0x18f   : > { %3010 = vmatpush3.bf16.msra.mxu1 %v3009_v51  ;;  %v1479_v51 = vld [vmem:[#allocation8 + $0x10] sm:$0xff] }
 0x190   : > { %3011 = vmatprep.subr.bf16.mxu1 %v3576_v0 }
 0x193   : > { %3013 = vmatpush3.bf16.msra.mxu1 %v3012_v61  ;;  %v1501_v61 = vand.u32 4294901760, %v1477_v33 }
 0x194   : > { %3014 = vmatprep.subr.bf16.mxu1 %v3576_v0 }
 0x195   : > { %v4037_v63 = vpack.c.bf16 %v1504_v6, %v1501_v61 }
 0x197   : > { %3016 = vmatpush3.bf16.msra.mxu1 %v3015_v8  ;;  %v1480_v8 = vld [vmem:[#allocation8 + $0x18] sm:$0xff]  ;;  %3124 = vmatpush3.bf16.msra.mxu0 %v4037_v63 }
 0x198   : > { %3017 = vmatprep.subr.bf16.mxu1 %v3576_v0  ;;  %3125 = vmatprep.subr.bf16.mxu0 %v3576_v0 }
 0x19b   : > { %3019 = vmatpush3.bf16.msra.mxu1 %v3018_v32  ;;  %v1507_v32 = vand.u32 4294901760, %v1479_v51 }
 0x19c   : > { %3020 = vmatprep.subr.bf16.mxu1 %v3576_v0 }
 0x19d   : > { %v4043_v60 = vsub.f32 %v1479_v51, %v1507_v32  ;;  %v1528_v51 = vand.u32 4294901760, %v1486_v59 }
 0x19f   : > { %3022 = vmatpush3.bf16.msra.mxu1 %v3021_v52  ;;  %v1510_v52 = vand.u32 4294901760, %v1480_v8 }
 0x1a0   : > { %3023 = vmatprep.subr.bf16.mxu1 %v3576_v0 }
 0x1a1   : > { %v4045_v49 = vpack.c.bf16 %v1510_v52, %v1507_v32  ;;  %v4047_v48 = vsub.f32 %v1480_v8, %v1510_v52  ;;  %v4061_v8 = vsub.f32 %v1484_v56, %v1522_v40 }
 0x1a3   : > { %3025 = vmatpush3.bf16.msra.mxu1 %v3024_v2  ;;  %v1513_v2 = vand.u32 4294901760, %v1481_v46  ;;  %3127 = vmatpush3.bf16.msra.mxu0 %v4045_v49 }
 0x1a4   : > { %3026 = vmatprep.subr.bf16.mxu1 %v3576_v0  ;;  %3128 = vmatprep.subr.bf16.mxu0 %v3576_v0 }
 0x1a5   : > { %v4049_v38 = vsub.f32 %v1481_v46, %v1513_v2  ;;  %v4065_v46 = vsub.f32 %v1486_v59, %v1528_v51 }
 0x1a6   : > { %2608 = vmatmul.mubr.f32.vlgmr.msra.gmra.mrb[2].mxu1 %v4012_v31 }
 0x1a7   : > { %3028 = vmatpush3.bf16.msra.mxu1 %v3027_v3  ;;  %2642 = vmatprep.mubr.msk.f32.mxu1 %vm3577_vm0, %v3578_v1  ;;  %v4039_v3 = vsub.f32 %v1477_v33, %v1501_v61  ;;  %v1519_v33 = vand.u32 4294901760, %v1483_v55  ;;  %v1525_v61 = vand.u32 4294901760, %v1485_v58 }
 0x1a8   : > { %3029 = vmatprep.subr.bf16.mxu1 %v3576_v0 }
 0x1a9   : > { %v4059_v6 = vsub.f32 %v1483_v55, %v1519_v33  ;;  %v4063_v32 = vsub.f32 %v1485_v58, %v1525_v61  ;;  %v4079_v59 = vpack.c.bf16 %v1522_v40, %v1519_v33 }
 0x1ab   : > { %3031 = vmatpush3.bf16.msra.mxu1 %v3030_v4  ;;  %v4071_v4 = vpack.c.bf16 %v1516_v41, %v1513_v2 }
 0x1ac   : > { %3032 = vmatprep.subr.bf16.mxu1 %v3576_v0 }
 0x1ad   : > { %3130 = vmatpush3.bf16.msra.mxu0 %v4071_v4 }
 0x1ae   : > { %3131 = vmatprep.subr.bf16.mxu0 %v3576_v0 }
 0x1af   : > { %3034 = vmatpush3.bf16.msra.mxu1 %v3033_v9  ;;  %v4087_v9 = vpack.c.bf16 %v1528_v51, %v1525_v61 }
 0x1b0   : > { %3035 = vmatprep.subr.bf16.mxu1 %v3576_v0 }
 0x1b1   : > { %3133 = vmatpush3.bf16.msra.mxu0 %v4079_v59 }
 0x1b2   : > { %3134 = vmatprep.subr.bf16.mxu0 %v3576_v0 }
 0x1b3   : > { %3037 = vmatpush3.bf16.msra.mxu1 %v3036_v23  ;;  %v3075_v23 = vpack.c.bf16 %v936_v11, %v929_v10  ;;  %v3081_v10 = vpack.c.bf16 %v4497_v22, %v4496_v21  ;;  %v4498_v11 = vand.u32 4294901760, %v3888_v53  ;;  %v4504_v53 = vand.u32 4294901760, %v3915_v16 }
 0x1b4   : > { %3038 = vmatprep.subr.bf16.mxu1 %v3576_v0  ;;  %v1540_v16 = vand.u32 4294901760, %v1490_v15 }
 0x1b5   : > { %3136 = vmatpush3.bf16.msra.mxu0 %v4087_v9  ;;  %v3084_v29 = vpack.c.bf16 %v4499_v28, %v4498_v11  ;;  %v1622_v11 = vand.u32 4294901760, %v4049_v38  ;;  %v1629_v28 = vand.u32 4294901760, %v4055_v37 }
 0x1b6   : > { %3137 = vmatprep.subr.bf16.mxu0 %v3576_v0  ;;  %v4211_v58 = vsub.f32 %v1490_v15, %v1540_v16 }
 0x1b7   : > { %3040 = vmatpush3.bf16.msra.mxu1 %v3039_v24  ;;  %v3078_v24 = vpack.c.bf16 %v950_v26, %v943_v25  ;;  %v4500_v25 = vand.u32 4294901760, %v3907_v12  ;;  %v4501_v26 = vand.u32 4294901760, %v3909_v13  ;;  %v4506_v12 = vand.u32 4294901760, %v3921_v19 }
 0x1b8   : > { %3041 = vmatprep.subr.bf16.mxu1 %v3576_v0  ;;  %v4507_v13 = vand.u32 4294901760, %v3923_v20  ;;  %v1543_v19 = vand.u32 4294901760, %v1491_v17 }
 0x1ba   : > { %v4214_v33 = vsub.f32 %v1491_v17, %v1543_v19 }
 0x1bb   : > { %3043 = vmatpush3.bf16.msra.mxu1 %v3042_v27  ;;  %v3093_v27 = vpack.c.bf16 %v4505_v54, %v4504_v53  ;;  %v1636_v53 = vand.u32 4294901760, %v4059_v6  ;;  %v1643_v54 = vand.u32 4294901760, %v4061_v8 }
 0x1bc   : > { %3044 = vmatprep.subr.bf16.mxu1 %v3576_v0 }
 0x1bf   : > { %3046 = vmatpush3.bf16.msra.mxu1 %v3045_v34  ;;  %v3096_v34 = vpack.c.bf16 %v4507_v13, %v4506_v12  ;;  %v1637_v12 = vsub.f32 %v4059_v6, %v1636_v53  ;;  %v1644_v13 = vsub.f32 %v4061_v8, %v1643_v54 }
 0x1c0   : > { %3047 = vmatprep.subr.bf16.mxu1 %v3576_v0 }
 0x1c3   : > { %3049 = vmatpush3.bf16.msra.mxu1 %v3048_v35  ;;  %v1601_v35 = vand.u32 4294901760, %v4041_v42 }
 0x1c4   : > { %3050 = vmatprep.subr.bf16.mxu1 %v3576_v0 }
 0x1c5   : > { %v1602_v2 = vsub.f32 %v4041_v42, %v1601_v35 }
 0x1c6   : > { %2643 = vmatmul.mubr.f32.vlgmr.msra.gmra.mrb[2].mxu1 %v4015_v30  ;;  %v3090_v30 = vpack.c.bf16 %v4503_v39, %v4502_v36 }
 0x1c7   : > { %3052 = vmatpush3.bf16.msra.mxu1 %v3869_v43  ;;  %2677 = vmatprep.mubr.msk.f32.mxu1 %vm3577_vm0, %v3578_v1  ;;  %v1603_v51 = vand.u32 4294901760, %v1602_v2 }
 0x1c8   : > { %3053 = vmatprep.subr.bf16.mxu1 %v3576_v0 }
 0x1cb   : > { %3055 = vmatpush3.bf16.msra.mxu1 %v3874_v44 }
 0x1cc   : > { %3056 = vmatprep.subr.bf16.mxu1 %v3576_v0 }
 0x1cf   : > { %3058 = vmatpush3.bf16.msra.mxu1 %v3880_v45 }
 0x1d0   : > { %3059 = vmatprep.subr.bf16.mxu1 %v3576_v0 }
 0x1d3   : > { %3061 = vmatpush3.bf16.msra.mxu1 %v3885_v50 }
 0x1d4   : > { %3062 = vmatprep.subr.bf16.mxu1 %v3576_v0 }
 0x1d7   : > { %3064 = vmatpush3.bf16.msra.mxu1 %v3893_v57 }
 0x1d8   : > { %3065 = vmatprep.subr.bf16.mxu1 %v3576_v0 }
 0x1db   : > { %3067 = vmatpush3.bf16.msra.mxu1 %v3897_v62 }
 0x1dc   : > { %3068 = vmatprep.subr.bf16.mxu1 %v3576_v0 }
 0x1df   : > { %3070 = vmatpush3.bf16.msra.mxu1 %v3901_v5 }
 0x1e0   : > { %3071 = vmatprep.subr.bf16.mxu1 %v3576_v0 }
 0x1e3   : > { %3073 = vmatpush3.bf16.msra.mxu1 %v3919_v18 }
 0x1e4   : > { %3074 = vmatprep.subr.bf16.mxu1 %v3576_v0 }
 0x1e6   : > { %2678 = vmatmul.mubr.f32.vlgmr.msra.gmra.mrb[2].mxu1 %v918_v7  ;;  %v3087_v7 = vpack.c.bf16 %v4501_v26, %v4500_v25  ;;  %v1623_v26 = vsub.f32 %v4049_v38, %v1622_v11 }
 0x1e7   : > { %3076 = vmatpush3.bf16.msra.mxu1 %v3075_v23  ;;  %2712 = vmatprep.mubr.msk.f32.mxu1 %vm3577_vm0, %v3578_v1  ;;  %v1608_v23 = vand.u32 4294901760, %v4043_v60 }
 0x1e8   : > { %3077 = vmatprep.subr.bf16.mxu1 %v3576_v0  ;;  %v1624_v39 = vand.u32 4294901760, %v1623_v26 }
 0x1e9   : > { %v1609_v22 = vsub.f32 %v4043_v60, %v1608_v23 }
 0x1eb   : > { %3079 = vmatpush3.bf16.msra.mxu1 %v3078_v24  ;;  %v1615_v24 = vand.u32 4294901760, %v4047_v48 }
 0x1ec   : > { %3080 = vmatprep.subr.bf16.mxu1 %v3576_v0 }
 0x1ef   : > { %3082 = vmatpush3.bf16.msra.mxu1 %v3081_v10  ;;  %v1616_v10 = vsub.f32 %v4047_v48, %v1615_v24 }
 0x1f0   : > { %3083 = vmatprep.subr.bf16.mxu1 %v3576_v0 }
 0x1f1   : > { %v1617_v25 = vand.u32 4294901760, %v1616_v10 }
 0x1f3   : > { %3085 = vmatpush3.bf16.msra.mxu1 %v3084_v29  ;;  %v1610_v29 = vand.u32 4294901760, %v1609_v22  ;;  %v4479_v22 = vand.u32 4294901760, %v4211_v58 }
 0x1f4   : > { %3086 = vmatprep.subr.bf16.mxu1 %v3576_v0 }
 0x1f5   : > { %v3150_v36 = vpack.c.bf16 %v1617_v25, %v1610_v29  ;;  %v1686_v25 = vsub.f32 %v4211_v58, %v4479_v22 }
 0x1f7   : > { %3088 = vmatpush3.bf16.msra.mxu1 %v3087_v7  ;;  %v1630_v7 = vsub.f32 %v4055_v37, %v1629_v28 }
 0x1f8   : > { %3089 = vmatprep.subr.bf16.mxu1 %v3576_v0 }
 0x1fb   : > { %3091 = vmatpush3.bf16.msra.mxu1 %v3090_v30  ;;  %v1631_v30 = vand.u32 4294901760, %v1630_v7  ;;  %v1687_v7 = vand.u32 4294901760, %v1686_v25 }
 0x1fc   : > { %3092 = vmatprep.subr.bf16.mxu1 %v3576_v0 }
 0x1ff   : > { %3094 = vmatpush3.bf16.msra.mxu1 %v3093_v27  ;;  %v3153_v27 = vpack.c.bf16 %v1631_v30, %v1624_v39  ;;  %v4478_v39 = vand.u32 4294901760, %v4214_v33 }
 0x200   : > { %3095 = vmatprep.subr.bf16.mxu1 %v3576_v0 }
 0x203   : > { %3097 = vmatpush3.bf16.msra.mxu1 %v3096_v34  ;;  %v1638_v34 = vand.u32 4294901760, %v1637_v12 }
 0x204   : > { %3098 = vmatprep.subr.bf16.mxu1 %v3576_v0 }
 0x206   : > { %2713 = vmatmul.mubr.f32.vlgmr.msra.gmra.mrb[2].mxu1 %v4012_v31 }
 0x207   : > { %3100 = vmatpush3.bf16.msra.mxu1 %v3869_v43  ;;  %2747 = vmatprep.mubr.msk.f32.mxu1 %vm3577_vm0, %v3578_v1  ;;  %v1487_v43 = vld [vmem:[#allocation8 + $0x50] sm:$0xff] }
 0x208   : > { %3101 = vmatprep.subr.bf16.mxu1 %v3576_v0 }
 0x20b   : > { %3103 = vmatpush3.bf16.msra.mxu1 %v3874_v44  ;;  %v1488_v44 = vld [vmem:[#allocation8 + $0x58] sm:$0xff] }
 0x20c   : > { %3104 = vmatprep.subr.bf16.mxu1 %v3576_v0 }
 0x20f   : > { %3106 = vmatpush3.bf16.msra.mxu1 %v3880_v45  ;;  %v1531_v45 = vand.u32 4294901760, %v1487_v43 }
 0x210   : > { %3107 = vmatprep.subr.bf16.mxu1 %v3576_v0 }
 0x211   : > { %v4205_v41 = vsub.f32 %v1487_v43, %v1531_v45  ;;  %v1645_v43 = vand.u32 4294901760, %v1644_v13  ;;  %v1693_v13 = vsub.f32 %v4214_v33, %v4478_v39 }
 0x213   : > { %3109 = vmatpush3.bf16.msra.mxu1 %v3885_v50  ;;  %v1534_v50 = vand.u32 4294901760, %v1488_v44  ;;  %v1664_v17 = vand.u32 4294901760, %v4205_v41 }
 0x214   : > { %3110 = vmatprep.subr.bf16.mxu1 %v3576_v0 }
 0x215   : > { %v4187_v14 = vpack.c.bf16 %v1534_v50, %v1531_v45  ;;  %v4207_v55 = vsub.f32 %v1488_v44, %v1534_v50  ;;  %v1650_v44 = vand.u32 4294901760, %v4063_v32  ;;  %v1657_v45 = vand.u32 4294901760, %v4065_v46 }
 0x216   : > { %v3156_v50 = vpack.c.bf16 %v1645_v43, %v1638_v34  ;;  %v1694_v43 = vand.u32 4294901760, %v1693_v13 }
 0x217   : > { %3112 = vmatpush3.bf16.msra.mxu1 %v3893_v57  ;;  %v1489_v57 = vld [vmem:[#allocation8 + $0x60] sm:$0xff]  ;;  %3139 = vmatpush3.bf16.msra.mxu0 %v4187_v14  ;;  %v1658_v15 = vsub.f32 %v4065_v46, %v1657_v45 }
 0x218   : > { %3113 = vmatprep.subr.bf16.mxu1 %v3576_v0  ;;  %3140 = vmatprep.subr.bf16.mxu0 %v3576_v0 }
 0x21b   : > { %3115 = vmatpush3.bf16.msra.mxu1 %v3897_v62  ;;  %v1537_v62 = vand.u32 4294901760, %v1489_v57 }
 0x21c   : > { %3116 = vmatprep.subr.bf16.mxu1 %v3576_v0 }
 0x21d   : > { %v4209_v56 = vsub.f32 %v1489_v57, %v1537_v62  ;;  %v1651_v57 = vsub.f32 %v4063_v32, %v1650_v44 }
 0x21f   : > { %3118 = vmatpush3.bf16.msra.mxu1 %v3901_v5  ;;  %v4191_v5 = vpack.c.bf16 %v1540_v16, %v1537_v62  ;;  %v1652_v62 = vand.u32 4294901760, %v1651_v57  ;;  %v1659_v16 = vand.u32 4294901760, %v1658_v15 }
 0x220   : > { %3119 = vmatprep.subr.bf16.mxu1 %v3576_v0 }
 0x221   : > { %3142 = vmatpush3.bf16.msra.mxu0 %v4191_v5 }
 0x222   : > { %3143 = vmatprep.subr.bf16.mxu0 %v3576_v0 }
 0x223   : > { %3121 = vmatpush3.bf16.msra.mxu1 %v3919_v18  ;;  %v1492_v18 = vld [vmem:[#allocation8 + $0x78] sm:$0xff] }
 0x224   : > { %v1546_v20 = vand.u32 4294901760, %v1492_v18 }
 0x226   : > { %2748 = vmatmul.mubr.f32.vlgmr.msra.gmra.mrb[2].mxu1 %v4012_v31  ;;  %v1594_v31 = vand.u32 4294901760, %v4039_v3  ;;  %v4197_v47 = vpack.c.bf16 %v1546_v20, %v1543_v19  ;;  %v4216_v40 = vsub.f32 %v1492_v18, %v1546_v20  ;;  %v1671_v18 = vand.u32 4294901760, %v4207_v55 }
 0x227   : > { %v3159_v19 = vpack.c.bf16 %v1659_v16, %v1652_v62  ;;  %v1665_v20 = vsub.f32 %v4205_v41, %v1664_v17  ;;  %v3171_v62 = vpack.c.bf16 %v4041_v42, %v4039_v3  ;;  %v3174_v16 = vpack.c.bf16 %v4047_v48, %v4043_v60 }
 0x228   : > { %v1595_v52 = vsub.f32 %v4039_v3, %v1594_v31  ;;  %3145 = vmatpush3.bf16.msra.mxu0 %v4197_v47  ;;  %v4477_v30 = vand.u32 4294901760, %v4216_v40  ;;  %v3192_v25 = vpack.c.bf16 %v4216_v40, %v4214_v33  ;;  %v3225_v3 = vpack.c.bf16 %v1629_v28, %v1622_v11 }
 0x229   : > { %3146 = vmatprep.subr.bf16.mxu0 %v3576_v0  ;;  %v1666_v2 = vand.u32 4294901760, %v1665_v20  ;;  %v3177_v20 = vpack.c.bf16 %v4055_v37, %v4049_v38  ;;  %v3228_v48 = vpack.c.bf16 %v1643_v54, %v1636_v53  ;;  %v3231_v60 = vpack.c.bf16 %v1657_v45, %v1650_v44 }
 0x22a   : > { %v1596_v61 = vand.u32 4294901760, %v1595_v52  ;;  %v1672_v52 = vsub.f32 %v4207_v55, %v1671_v18  ;;  %v1700_v34 = vsub.f32 %v4216_v40, %v4477_v30  ;;  %v3234_v37 = vpack.c.bf16 %v1671_v18, %v1664_v17 }
 0x22b   : > { %v4508_v38 = vand.u32 4294901760, %v4209_v56  ;;  %v4509_v42 = vand.u32 4294901760, %v4211_v58 }
 0x22c   : > { %v4221_v21 = vpack.c.bf16 %v1603_v51, %v1596_v61  ;;  %v1673_v61 = vand.u32 4294901760, %v1672_v52  ;;  %v4480_v51 = vand.u32 4294901760, %v4209_v56  ;;  %v1701_v57 = vand.u32 4294901760, %v1700_v34 }
 0x22d   : > { %v3180_v52 = vpack.c.bf16 %v4061_v8, %v4059_v6  ;;  %v3237_v6 = vpack.c.bf16 %v4509_v42, %v4508_v38  ;;  %v4510_v8 = vand.u32 4294901760, %v4214_v33 }
 0x22e   : > { %v3162_v10 = vpack.c.bf16 %v1673_v61, %v1666_v2  ;;  %v1679_v29 = vsub.f32 %v4209_v56, %v4480_v51  ;;  %v3168_v15 = vpack.c.bf16 %v1701_v57, %v1694_v43  ;;  %v3183_v2 = vpack.c.bf16 %v4065_v46, %v4063_v32 }
 0x22f   : > { %v3186_v61 = vpack.c.bf16 %v4207_v55, %v4205_v41  ;;  %v4511_v32 = vand.u32 4294901760, %v4216_v40 }
 0x230   : > { %v1680_v26 = vand.u32 4294901760, %v1679_v29  ;;  %v3189_v29 = vpack.c.bf16 %v4211_v58, %v4209_v56 }
 0x231   : > { %v3240_v46 = vpack.c.bf16 %v4511_v32, %v4510_v8 }
 0x232   : > { %v3165_v12 = vpack.c.bf16 %v1687_v7, %v1680_v26  ;;  %v2270_v26 = vld [vmem:[%s4457_s4] ss:$0 sm:$0xff] }
 0x2f9   : > { %v1472_v7 = vpop.f32.mrb[2].mxu1 }
 0x2fa   : > { %v3268_v13 = vadd.f32 %v2270_v26, %v1472_v7  ;;  %v2749_v34 = vpop.f32.mrb[3].mxu1 }
 0x2fc   : > { %v1476_v43 = vmax.f32 %v3268_v13, 0.0 }
 0x2fe   : > { %v4296_v57 = vand.u32 4294901760, %v1476_v43 }
 0x300   : > { %v1582_v30 = vsub.f32 %v1476_v43, %v4296_v57 }
 0x302   : > { %v1583_v39 = vand.u32 4294901760, %v1582_v30 }
 0x304   : > { %v1584_v22 = vsub.f32 %v1582_v30, %v1583_v39 }
 0x306   : > { %v1585_v51 = vand.u32 4294901760, %v1584_v22 }
 0x308   : > { %2783 = vmatmul.mubr.f32.vlgmr.msra.gmra.mrb[2].mxu0 %v1585_v51 }
 0x309   : > { %3148 = vmatpush3.bf16.msra.mxu0 %v4221_v21  ;;  %2817 = vmatprep.mubr.msk.f32.mxu0 %vm3577_vm0, %v3578_v1  ;;  %v3219_v21 = vpack.c.bf16 %v1601_v35, %v1594_v31 }
 0x30a   : > { %3149 = vmatprep.subr.bf16.mxu0 %v3576_v0 }
 0x30d   : > { %3151 = vmatpush3.bf16.msra.mxu0 %v3150_v36  ;;  %v3222_v36 = vpack.c.bf16 %v1615_v24, %v1608_v23 }
 0x30e   : > { %3152 = vmatprep.subr.bf16.mxu0 %v3576_v0 }
 0x311   : > { %3154 = vmatpush3.bf16.msra.mxu0 %v3153_v27 }
 0x312   : > { %3155 = vmatprep.subr.bf16.mxu0 %v3576_v0 }
 0x315   : > { %3157 = vmatpush3.bf16.msra.mxu0 %v3156_v50 }
 0x316   : > { %3158 = vmatprep.subr.bf16.mxu0 %v3576_v0 }
 0x319   : > { %3160 = vmatpush3.bf16.msra.mxu0 %v3159_v19 }
 0x31a   : > { %3161 = vmatprep.subr.bf16.mxu0 %v3576_v0 }
 0x31d   : > { %3163 = vmatpush3.bf16.msra.mxu0 %v3162_v10 }
 0x31e   : > { %3164 = vmatprep.subr.bf16.mxu0 %v3576_v0 }
 0x321   : > { %3166 = vmatpush3.bf16.msra.mxu0 %v3165_v12 }
 0x322   : > { %3167 = vmatprep.subr.bf16.mxu0 %v3576_v0 }
 0x325   : > { %3169 = vmatpush3.bf16.msra.mxu0 %v3168_v15 }
 0x326   : > { %3170 = vmatprep.subr.bf16.mxu0 %v3576_v0 }
 0x328   : > { %2818 = vmatmul.mubr.f32.vlgmr.msra.gmra.mrb[2].mxu0 %v4296_v57 }
 0x329   : > { %3172 = vmatpush3.bf16.msra.mxu0 %v3171_v62  ;;  %2852 = vmatprep.mubr.msk.f32.mxu0 %vm3577_vm0, %v3578_v1 }
 0x32a   : > { %3173 = vmatprep.subr.bf16.mxu0 %v3576_v0 }
 0x32d   : > { %3175 = vmatpush3.bf16.msra.mxu0 %v3174_v16 }
 0x32e   : > { %3176 = vmatprep.subr.bf16.mxu0 %v3576_v0 }
 0x331   : > { %3178 = vmatpush3.bf16.msra.mxu0 %v3177_v20 }
 0x332   : > { %3179 = vmatprep.subr.bf16.mxu0 %v3576_v0 }
 0x335   : > { %3181 = vmatpush3.bf16.msra.mxu0 %v3180_v52 }
 0x336   : > { %3182 = vmatprep.subr.bf16.mxu0 %v3576_v0 }
 0x339   : > { %3184 = vmatpush3.bf16.msra.mxu0 %v3183_v2 }
 0x33a   : > { %3185 = vmatprep.subr.bf16.mxu0 %v3576_v0 }
 0x33d   : > { %3187 = vmatpush3.bf16.msra.mxu0 %v3186_v61 }
 0x33e   : > { %3188 = vmatprep.subr.bf16.mxu0 %v3576_v0 }
 0x341   : > { %3190 = vmatpush3.bf16.msra.mxu0 %v3189_v29 }
 0x342   : > { %3191 = vmatprep.subr.bf16.mxu0 %v3576_v0 }
 0x345   : > { %3193 = vmatpush3.bf16.msra.mxu0 %v3192_v25 }
 0x346   : > { %3194 = vmatprep.subr.bf16.mxu0 %v3576_v0 }
 0x348   : > { %2853 = vmatmul.mubr.f32.vlgmr.msra.gmra.mrb[2].mxu0 %v1582_v30 }
 0x349   : > { %3196 = vmatpush3.bf16.msra.mxu0 %v4037_v63  ;;  %2887 = vmatprep.mubr.msk.f32.mxu0 %vm3577_vm0, %v3578_v1 }
 0x34a   : > { %3197 = vmatprep.subr.bf16.mxu0 %v3576_v0 }
 0x34d   : > { %3199 = vmatpush3.bf16.msra.mxu0 %v4045_v49 }
 0x34e   : > { %3200 = vmatprep.subr.bf16.mxu0 %v3576_v0 }
 0x351   : > { %3202 = vmatpush3.bf16.msra.mxu0 %v4071_v4 }
 0x352   : > { %3203 = vmatprep.subr.bf16.mxu0 %v3576_v0 }
 0x355   : > { %3205 = vmatpush3.bf16.msra.mxu0 %v4079_v59 }
 0x356   : > { %3206 = vmatprep.subr.bf16.mxu0 %v3576_v0 }
 0x359   : > { %3208 = vmatpush3.bf16.msra.mxu0 %v4087_v9 }
 0x35a   : > { %3209 = vmatprep.subr.bf16.mxu0 %v3576_v0 }
 0x35d   : > { %3211 = vmatpush3.bf16.msra.mxu0 %v4187_v14 }
 0x35e   : > { %3212 = vmatprep.subr.bf16.mxu0 %v3576_v0 }
 0x361   : > { %3214 = vmatpush3.bf16.msra.mxu0 %v4191_v5 }
 0x362   : > { %3215 = vmatprep.subr.bf16.mxu0 %v3576_v0 }
 0x365   : > { %3217 = vmatpush3.bf16.msra.mxu0 %v4197_v47 }
 0x366   : > { %3218 = vmatprep.subr.bf16.mxu0 %v3576_v0 }
 0x368   : > { %2888 = vmatmul.mubr.f32.vlgmr.msra.gmra.mrb[2].mxu0 %v1583_v39 }
 0x369   : > { %3220 = vmatpush3.bf16.msra.mxu0 %v3219_v21  ;;  %2922 = vmatprep.mubr.msk.f32.mxu0 %vm3577_vm0, %v3578_v1 }
 0x36a   : > { %3221 = vmatprep.subr.bf16.mxu0 %v3576_v0 }
 0x36d   : > { %3223 = vmatpush3.bf16.msra.mxu0 %v3222_v36 }
 0x36e   : > { %3224 = vmatprep.subr.bf16.mxu0 %v3576_v0 }
 0x371   : > { %3226 = vmatpush3.bf16.msra.mxu0 %v3225_v3 }
 0x372   : > { %3227 = vmatprep.subr.bf16.mxu0 %v3576_v0 }
 0x375   : > { %3229 = vmatpush3.bf16.msra.mxu0 %v3228_v48 }
 0x376   : > { %3230 = vmatprep.subr.bf16.mxu0 %v3576_v0 }
 0x379   : > { %3232 = vmatpush3.bf16.msra.mxu0 %v3231_v60 }
 0x37a   : > { %3233 = vmatprep.subr.bf16.mxu0 %v3576_v0 }
 0x37d   : > { %3235 = vmatpush3.bf16.msra.mxu0 %v3234_v37 }
 0x37e   : > { %3236 = vmatprep.subr.bf16.mxu0 %v3576_v0 }
 0x381   : > { %3238 = vmatpush3.bf16.msra.mxu0 %v3237_v6 }
 0x382   : > { %3239 = vmatprep.subr.bf16.mxu0 %v3576_v0 }
 0x385   : > { %3241 = vmatpush3.bf16.msra.mxu0 %v3240_v46 }
 0x386   : > { %3242 = vmatprep.subr.bf16.mxu0 %v3576_v0 }
 0x388   : > { %2923 = vmatmul.mubr.f32.vlgmr.msra.gmra.mrb[2].mxu0 %v4296_v57 }
 0x389   : > { %3244 = vmatpush3.bf16.msra.mxu0 %v4037_v63  ;;  %2957 = vmatprep.mubr.msk.f32.mxu0 %vm3577_vm0, %v3578_v1  ;;  %v2271_v1 = vld [vmem:[%s4459_s6] ss:$0 sm:$0xff] }
 0x38a   : > { %3245 = vmatprep.subr.bf16.mxu0 %v3576_v0 }
 0x38d   : > { %3247 = vmatpush3.bf16.msra.mxu0 %v4045_v49 }
 0x38e   : > { %3248 = vmatprep.subr.bf16.mxu0 %v3576_v0 }
 0x391   : > { %3250 = vmatpush3.bf16.msra.mxu0 %v4071_v4 }
 0x392   : > { %3251 = vmatprep.subr.bf16.mxu0 %v3576_v0 }
 0x395   : > { %3253 = vmatpush3.bf16.msra.mxu0 %v4079_v59 }
 0x396   : > { %3254 = vmatprep.subr.bf16.mxu0 %v3576_v0 }
 0x399   : > { %3256 = vmatpush3.bf16.msra.mxu0 %v4087_v9 }
 0x39a   : > { %3257 = vmatprep.subr.bf16.mxu0 %v3576_v0 }
 0x39d   : > { %3259 = vmatpush3.bf16.msra.mxu0 %v4187_v14 }
 0x39e   : > { %3260 = vmatprep.subr.bf16.mxu0 %v3576_v0 }
 0x3a1   : > { %3262 = vmatpush3.bf16.msra.mxu0 %v4191_v5 }
 0x3a2   : > { %3263 = vmatprep.subr.bf16.mxu0 %v3576_v0 }
 0x3a5   : > { %3265 = vmatpush3.bf16.msra.mxu0 %v4197_v47 }
 0x3a8   : > { %2958 = vmatmul.mubr.f32.vlgmr.msra.gmra.mrb[2].mxu0 %v4296_v57 }
 0x47b   : > { %v2137_v49 = vpop.f32.mrb[2].mxu0 }
 0x47c   : > { %v3269_v63 = vadd.f32 %v2271_v1, %v2137_v49  ;;  %v2959_v4 = vpop.f32.mrb[3].mxu0 }
 0x47e   : > { %2141 = vst [vmem:[%s337_s20] sm:$0xff] %v3269_v63 }
 0x47f   : > { %3507 = shalt.err (!%p3504_p4)
}
 0x480   : > { %s3508_s8 = scalar_lea.hbm %s4409_s21, 128  ;;  %s3512_s11 = scalar_lea.hbm %s4460_s7, 256 }
 0x481   : > { %p3509_p0 = scmp.ne.s32.totalorder %s4409_s21, %s3508_s8  ;;  %p3513_p8 = scmp.lt.u32.totalorder %s4409_s21, %s4460_s7 }
 0x482   : > { %p3514_p13 = scmp.lt.u32.totalorder %s3512_s11, %s3508_s8  ;;  %p3516_p10 = scmp.lt.u32.totalorder %s3508_s8, %s4409_s21 }
 0x483   : > { %p3510_p9 = pnand %p3509_p0, %p3774_p5 }
 0x484   : > { %p3515_p6 = por %p3514_p13, %p3513_p8 }
 0x485   : > { %p3511_p11 = pneg %p3510_p9 }
 0x486   : > { %p3517_p3 = por %p3516_p10, %p3515_p6 }
 0x488   : > { %p3518_p7 = pnand %p3517_p3, %p3511_p11 }
 0x48a   : > { %3521 = shalt.err (!%p3518_p7)
}
 0x48b   : > { %3312 = dma.vmem_to_hbm [thread:$0]  (%p3774_p5), %s4411_s15, 128, %s4409_s21, %s2143_s16  }
 0x48c PF: > { %s4512_s20 = sld [smem:[#allocation15_spill]]  ;;  %s2168_s29 = sand.u32 1, %s3556_s24  }
 0x48d   : > { %p4514_p1 = scmp.ge.s32.totalorder %s3568_s27, 2  ;;  %s2169_s12 = scalar_lea.sflag [#allocation4], %s2168_s29 }
 0x492   : > { %p4513_p12 = scmp.ne.s32.totalorder %s4512_s20, 0 }
 0x494   : > { %p3329_p2 = pnand %p4514_p1, %p4513_p12 }
 0x496   : > { %3551 = dma.done.wait (!%p3329_p2), %s2169_s12, 128  }
 0x497   : > { %3553 = vsyncadd (!%p3329_p2), %s2169_s12, 4294967168  ;;  %p22_p4 = scmp.ge.s32.totalorder %s3760_s22, 4   ;;  %s4515_s24 = smov %s3560_s25 }
 0x498   : > { %s4516_s25 = smov %s3564_s26  ;;  %s4517_s26 = smov %s3770_s18 }
 0x499   : > { %s4518_s27 = smov %s3760_s22  ;;  %24 = sbr.rel (!%p22_p4) target bundleno = 7 (0x7), region = 105 }
 0x4a0   :  { %2174 = vsyncpa [#allocation3], 1 }
 0x4a1   :  { %2176 = vsyncpa [#allocation3 + $0x1], 1 }
 0x4a2   :  { %2177 = vsyncpa [#allocation6], 1 }
 0x4a3   :  { %2178 = vsyncpa [#allocation9], 1 }
 0x4a4   :  { %2179 = vsyncpa [#allocation4], 1 }
 0x4a5   :  { %2181 = vsyncpa [#allocation4 + $0x1], 1 }

</bundles_post_ra>
